<compile_context>
chip_gen: v7x
topology: tpu7x:2x2x1
jax: 0.10.0
libtpu: 0.0.40
codegen_flags: <defaults>
</compile_context>

<pallas_src>
import functools

import jax
import jax.numpy as jnp
from jax.experimental import pallas as pl
from jax.experimental.pallas import tpu as pltpu

MINIMUM_LENGTH = 1024  # kept for reference; padding is now only to tile bound
# TOTAL_DIM / AUDIO_DIM / CONTEXT_DIM are not defined in the snippet; use small
# synthetic values consistent with the module's I/O contract.
TOTAL_DIM = 4
AUDIO_DIM = 4
CONTEXT_DIM = 8
DIM_H = 32


# ----------------------------------------------------------------------------
# Pallas kernel: one (batch, sequence-tile) per grid step.
# ----------------------------------------------------------------------------
def _osu_fusion_kernel(
    scal_ref,     # SMEM (B, 2) int32: [:,0]=channel-mask limit, [:,1]=orig_n
    x_ref,        # (1, TOTAL_DIM, TILE_N)  clean beatmap tile
    a_ref,        # (1, AUDIO_DIM, TILE_N)  audio feature tile
    noise_ref,    # (1, TOTAL_DIM, TILE_N)  gaussian noise tile (== target)
    w1x_sa_ref,   # (1, DIM_H, TOTAL_DIM)   sqrt(acp[t_b])   * W1x
    w1x_sb_ref,   # (1, DIM_H, TOTAL_DIM)   sqrt(1-acp[t_b]) * W1x
    w1a_ref,      # (DIM_H, AUDIO_DIM)
    bias1_ref,    # (1, DIM_H, 1)           b1 + temb + keep*(Wc @ c)
    w2_ref,       # (TOTAL_DIM, DIM_H)
    b2_ref,       # (TOTAL_DIM, 1)
    out_ref,      # (1, 1, 1, 1)            per-(batch, tile) sum of sq. error
    *,
    tile_n: int,
    apply_chan_mask: bool,
):
    b = pl.program_id(0)
    k = pl.program_id(1)

    x = x_ref[0]        # (TOTAL_DIM, TILE_N)
    nz = noise_ref[0]   # (TOTAL_DIM, TILE_N)
    a = a_ref[0]        # (AUDIO_DIM, TILE_N)

    # UNet stand-in: pointwise conv -> SiLU -> pointwise conv, with the DDPM
    # add_noise (sa*x + sb*noise) folded into two pre-scaled copies of W1x.
    # TODO(synk): the real UNet (cross-embed conv stack, down/up blocks,
    # attention w/ rotary emb) is not defined in the provided snippet, so a
    # pointwise stand-in with the same I/O contract is used instead.
    h = (
        jnp.dot(w1x_sa_ref[0], x, preferred_element_type=jnp.float32)
        + jnp.dot(w1x_sb_ref[0], nz, preferred_element_type=jnp.float32)
        + jnp.dot(w1a_ref[...], a, preferred_element_type=jnp.float32)
        + bias1_ref[0]
    )                                              # (DIM_H, TILE_N) f32
    h = h * jax.nn.sigmoid(h)                      # SiLU (EUP)
    pred = (
        jnp.dot(w2_ref[...], h, preferred_element_type=jnp.float32)
        + b2_ref[...]
    )                                              # (TOTAL_DIM, TILE_N) f32

    diff = pred - nz.astype(jnp.float32)
    sq = diff * diff

    if apply_chan_mask:
        # Faithful to the reference `losses[i, orig:] = 0.0`, which indexes
        # dim 1 (the channel axis).
        chan_idx = jax.lax.broadcasted_iota(jnp.int32, sq.shape, 0)
        sq = jnp.where(chan_idx < scal_ref[b, 0], sq, 0.0)

    last = pl.num_programs(1) - 1

    @pl.when(k < last)
    def _():  # interior tiles lie fully inside [0, orig_n): no masking needed
        out_ref[0, 0] = jnp.sum(sq, keepdims=True)

    @pl.when(k == last)
    def _():  # the last tile may straddle orig_n: mask the padded tail columns
        seq_idx = jax.lax.broadcasted_iota(jnp.int32, sq.shape, 1) + k * tile_n
        sq_m = jnp.where(seq_idx < scal_ref[b, 1], sq, 0.0)
        out_ref[0, 0] = jnp.sum(sq_m, keepdims=True)


# ----------------------------------------------------------------------------
# Glue: DDPM schedule, embeddings, parameter init, pallas_call wrapper
# ----------------------------------------------------------------------------
def ddpm_alphas_cumprod(num_train_timesteps=1000, beta_start=1e-4, beta_end=2e-2):
    # diffusers DDPMScheduler(beta_schedule="scaled_linear") defaults
    betas = (
        jnp.linspace(beta_start ** 0.5, beta_end ** 0.5, num_train_timesteps,
                     dtype=jnp.float32) ** 2
    )
    return jnp.cumprod(1.0 - betas)


def timestep_embedding(t, dim):
    half = dim // 2
    freqs = jnp.exp(-jnp.log(10000.0) * jnp.arange(half, dtype=jnp.float32) / half)
    args = t.astype(jnp.float32)[:, None] * freqs[None, :]
    return jnp.concatenate([jnp.sin(args), jnp.cos(args)], axis=-1)  # (B, dim)


def init_params(key):
    ks = jax.random.split(key, 6)
    s = 0.1
    return dict(
        w1x=(jax.random.normal(ks[0], (DIM_H, TOTAL_DIM)) * s).astype(jnp.float32),
        w1a=(jax.random.normal(ks[1], (DIM_H, AUDIO_DIM)) * s).astype(jnp.float32),
        wc=(jax.random.normal(ks[2], (DIM_H, CONTEXT_DIM)) * s).astype(jnp.float32),
        b1=jnp.zeros((DIM_H, 1), jnp.float32),
        w2=(jax.random.normal(ks[3], (TOTAL_DIM, DIM_H)) * s).astype(jnp.float32),
        b2=jnp.zeros((TOTAL_DIM, 1), jnp.float32),
    )


def osu_fusion_forward(params, x, a, c, key, *, orig_len=None,
                       cond_drop_prob=0.25, train_timesteps=1000,
                       tile_n_max=4096, input_dtype=jnp.float32):
    B, _, orig_n = x.shape
    assert a.shape[-1] == orig_n, "x and a must have the same sequence length"

    # Tile geometry: pad only up to a 128-lane-aligned tile boundary.
    tile_n = min(tile_n_max, ((orig_n + 127) // 128) * 128)
    n_tiles = -(-orig_n // tile_n)
    padded_n = n_tiles * tile_n

    def pad_seq(arr):
        return jnp.pad(arr, ((0, 0), (0, 0), (0, padded_n - arr.shape[-1])))

    x_pad = pad_seq(x.astype(jnp.float32)).astype(input_dtype)
    a_pad = pad_seq(a.astype(jnp.float32)).astype(input_dtype)

    k_noise, k_t, k_drop = jax.random.split(key, 3)
    noise = jax.random.normal(k_noise, (B, TOTAL_DIM, padded_n),
                              dtype=jnp.float32).astype(input_dtype)
    timesteps = jax.random.randint(k_t, (B,), 0, train_timesteps)

    acp = ddpm_alphas_cumprod(train_timesteps)
    sacp = jnp.sqrt(acp[timesteps]).astype(jnp.float32)        # (B,)
    s1m = jnp.sqrt(1.0 - acp[timesteps]).astype(jnp.float32)   # (B,)
    keep = (jax.random.uniform(k_drop, (B,)) >= cond_drop_prob).astype(jnp.float32)

    # Fold the DDPM scaling into per-batch first-layer weights and all
    # per-batch conditioning into one bias (tiny O(B*DIM_H) XLA work).
    w1x = params["w1x"]
    w1x_sa = sacp[:, None, None] * w1x[None]                   # (B, DIM_H, TOTAL_DIM)
    w1x_sb = s1m[:, None, None] * w1x[None]                    # (B, DIM_H, TOTAL_DIM)
    temb = timestep_embedding(timesteps, DIM_H)                # (B, DIM_H)
    cemb = jnp.einsum("bk,hk->bh", c.astype(jnp.float32), params["wc"])
    bias1 = (params["b1"][None, :, 0] + temb + keep[:, None] * cemb)[..., None]

    # Per-batch scalars for SMEM (scalar prefetch):
    #   [:,0] channel-mask limit (faithful `losses[i, orig:] = 0` on dim 1)
    #   [:,1] original sequence length (valid column count)
    if orig_len is None:
        chanlim = jnp.full((B,), TOTAL_DIM, jnp.int32)
        apply_chan_mask = False
    else:
        chanlim = jnp.asarray(orig_len, jnp.int32).reshape(B)
        apply_chan_mask = True
    scal = jnp.stack([chanlim, jnp.full((B,), orig_n, jnp.int32)], axis=1)

    kernel = functools.partial(_osu_fusion_kernel, tile_n=tile_n,
                               apply_chan_mask=apply_chan_mask)

    grid_spec = pltpu.PrefetchScalarGridSpec(
        num_scalar_prefetch=1,
        grid=(B, n_tiles),
        in_specs=[
            pl.BlockSpec((1, TOTAL_DIM, tile_n), lambda b, k, s: (b, 0, k)),   # x
            pl.BlockSpec((1, AUDIO_DIM, tile_n), lambda b, k, s: (b, 0, k)),   # a
            pl.BlockSpec((1, TOTAL_DIM, tile_n), lambda b, k, s: (b, 0, k)),   # noise
            pl.BlockSpec((1, DIM_H, TOTAL_DIM), lambda b, k, s: (b, 0, 0)),    # sa*W1x
            pl.BlockSpec((1, DIM_H, TOTAL_DIM), lambda b, k, s: (b, 0, 0)),    # sb*W1x
            pl.BlockSpec((DIM_H, AUDIO_DIM), lambda b, k, s: (0, 0)),          # W1a
            pl.BlockSpec((1, DIM_H, 1), lambda b, k, s: (b, 0, 0)),            # bias1
            pl.BlockSpec((TOTAL_DIM, DIM_H), lambda b, k, s: (0, 0)),          # W2
            pl.BlockSpec((TOTAL_DIM, 1), lambda b, k, s: (0, 0)),              # b2
        ],
        out_specs=pl.BlockSpec((1, 1, 1, 1), lambda b, k, s: (b, k, 0, 0)),
    )

    partial_sums = pl.pallas_call(
        kernel,
        out_shape=jax.ShapeDtypeStruct((B, n_tiles, 1, 1), jnp.float32),
        grid_spec=grid_spec,
        compiler_params=pltpu.CompilerParams(
            dimension_semantics=("parallel", "parallel")),
    )(scal, x_pad, a_pad, noise, w1x_sa, w1x_sb, params["w1a"], bias1,
      params["w2"], params["b2"])

    # Reference: losses are sliced to [0, orig_n); the zeroed (masked) entries
    # stay in the per-batch mean, so the denominator is TOTAL_DIM * orig_n,
    # followed by the batch mean.
    per_batch = jnp.sum(partial_sums[:, :, 0, 0], axis=1) / float(TOTAL_DIM * orig_n)
    return jnp.mean(per_batch)


# ----------------------------------------------------------------------------
if __name__ == "__main__":
    key = jax.random.PRNGKey(0)
    k_param, k_x, k_a, k_c, k_fwd = jax.random.split(key, 5)

    B, SEQ = 2, 40
    x = jax.random.normal(k_x, (B, TOTAL_DIM, SEQ), dtype=jnp.float32)
    a = jax.random.normal(k_a, (B, AUDIO_DIM, SEQ), dtype=jnp.float32)
    c = jax.random.normal(k_c, (B, CONTEXT_DIM), dtype=jnp.float32)

    params = init_params(k_param)

    # 1) main path: no orig_len masking, single sequence tile.
    loss = osu_fusion_forward(params, x, a, c, k_fwd, orig_len=None)
    jax.block_until_ready(loss)
    assert loss.shape == () and jnp.isfinite(loss)

    # 2) orig_len (channel-mask, dim-1 faithful) path.
    loss2 = osu_fusion_forward(params, x, a, c, k_fwd,
                               orig_len=jnp.array([3, TOTAL_DIM]))
    jax.block_until_ready(loss2)
    assert jnp.isfinite(loss2)

    # 3) multi-tile path: force 3 sequence tiles with a small tile size.
    SEQ2 = 300
    x2 = jax.random.normal(k_x, (B, TOTAL_DIM, SEQ2), dtype=jnp.float32)
    a2 = jax.random.normal(k_a, (B, AUDIO_DIM, SEQ2), dtype=jnp.float32)
    loss3 = osu_fusion_forward(params, x2, a2, c, k_fwd, tile_n_max=128)
    jax.block_until_ready(loss3)
    assert jnp.isfinite(loss3)

    print("KERNEL_OK")
</pallas_src>

<mosaic_0001>
module attributes {stable_mosaic.version = 11 : i64} {
  func.func @_osu_fusion_kernel(%arg0: i32, %arg1: i32, %arg2: memref<2x2xi32, #tpu.memory_space<smem>>, %arg3: memref<1x4x128xf32, #tpu.memory_space<vmem>>, %arg4: memref<1x4x128xf32, #tpu.memory_space<vmem>>, %arg5: memref<1x4x128xf32, #tpu.memory_space<vmem>>, %arg6: memref<1x32x4xf32, #tpu.memory_space<vmem>>, %arg7: memref<1x32x4xf32, #tpu.memory_space<vmem>>, %arg8: memref<32x4xf32, #tpu.memory_space<vmem>>, %arg9: memref<1x32x1xf32, #tpu.memory_space<vmem>>, %arg10: memref<4x32xf32, #tpu.memory_space<vmem>>, %arg11: memref<4x1xf32, #tpu.memory_space<vmem>>, %arg12: memref<1x1x1x1xf32, #tpu.memory_space<vmem>>) attributes {dimension_semantics = [#tpu.dimension_semantics<parallel>, #tpu.dimension_semantics<parallel>], iteration_bounds = array<i64: 2, 1>, scalar_prefetch = 1 : i64, scratch_operands = 0 : i64, tpu.core_type = #tpu.core_type<tc>, window_params = [{transform_indices = @transform_0, window_bounds = array<i64: 1, 4, 128>}, {transform_indices = @transform_1, window_bounds = array<i64: 1, 4, 128>}, {transform_indices = @transform_2, window_bounds = array<i64: 1, 4, 128>}, {transform_indices = @transform_3, window_bounds = array<i64: 1, 32, 4>}, {transform_indices = @transform_4, window_bounds = array<i64: 1, 32, 4>}, {pipeline_mode = #tpu.pipeline_mode<synchronous>, transform_indices = @transform_5, window_bounds = array<i64: 32, 4>}, {transform_indices = @transform_6, window_bounds = array<i64: 1, 32, 1>}, {pipeline_mode = #tpu.pipeline_mode<synchronous>, transform_indices = @transform_7, window_bounds = array<i64: 4, 32>}, {pipeline_mode = #tpu.pipeline_mode<synchronous>, transform_indices = @transform_8, window_bounds = array<i64: 4, 1>}, {transform_indices = @transform_9, window_bounds = array<i64: 1, 1, 1, 1>}]} {
    %c0 = arith.constant 0 : index
    %c0_0 = arith.constant 0 : index
    %c0_1 = arith.constant 0 : index
    %0 = vector.load %arg3[%c0, %c0_0, %c0_1] : memref<1x4x128xf32, #tpu.memory_space<vmem>>, vector<1x4x128xf32>
    %1 = vector.shape_cast %0 : vector<1x4x128xf32> to vector<4x128xf32>
    %c0_2 = arith.constant 0 : index
    %c0_3 = arith.constant 0 : index
    %c0_4 = arith.constant 0 : index
    %2 = vector.load %arg5[%c0_2, %c0_3, %c0_4] : memref<1x4x128xf32, #tpu.memory_space<vmem>>, vector<1x4x128xf32>
    %3 = vector.shape_cast %2 : vector<1x4x128xf32> to vector<4x128xf32>
    %c0_5 = arith.constant 0 : index
    %c0_6 = arith.constant 0 : index
    %c0_7 = arith.constant 0 : index
    %4 = vector.load %arg4[%c0_5, %c0_6, %c0_7] : memref<1x4x128xf32, #tpu.memory_space<vmem>>, vector<1x4x128xf32>
    %5 = vector.shape_cast %4 : vector<1x4x128xf32> to vector<4x128xf32>
    %c0_8 = arith.constant 0 : index
    %c0_9 = arith.constant 0 : index
    %c0_10 = arith.constant 0 : index
    %6 = vector.load %arg6[%c0_8, %c0_9, %c0_10] : memref<1x32x4xf32, #tpu.memory_space<vmem>>, vector<1x32x4xf32>
    %7 = vector.shape_cast %6 : vector<1x32x4xf32> to vector<32x4xf32>
    %cst = arith.constant dense<0.000000e+00> : vector<32x128xf32>
    %8 = tpu.matmul %7, %1, %cst {dimension_numbers = #tpu.dot_dimension_numbers<[1], [0], [0], [1], [0, 0, 1, 1], [], []>} : vector<32x4xf32>, vector<4x128xf32>, vector<32x128xf32> -> vector<32x128xf32>
    %c0_11 = arith.constant 0 : index
    %c0_12 = arith.constant 0 : index
    %c0_13 = arith.constant 0 : index
    %9 = vector.load %arg7[%c0_11, %c0_12, %c0_13] : memref<1x32x4xf32, #tpu.memory_space<vmem>>, vector<1x32x4xf32>
    %10 = vector.shape_cast %9 : vector<1x32x4xf32> to vector<32x4xf32>
    %cst_14 = arith.constant dense<0.000000e+00> : vector<32x128xf32>
    %11 = tpu.matmul %10, %3, %cst_14 {dimension_numbers = #tpu.dot_dimension_numbers<[1], [0], [0], [1], [0, 0, 1, 1], [], []>} : vector<32x4xf32>, vector<4x128xf32>, vector<32x128xf32> -> vector<32x128xf32>
    %12 = arith.addf %8, %11 : vector<32x128xf32>
    %c0_15 = arith.constant 0 : index
    %c0_16 = arith.constant 0 : index
    %13 = vector.load %arg8[%c0_15, %c0_16] : memref<32x4xf32, #tpu.memory_space<vmem>>, vector<32x4xf32>
    %cst_17 = arith.constant dense<0.000000e+00> : vector<32x128xf32>
    %14 = tpu.matmul %13, %5, %cst_17 {dimension_numbers = #tpu.dot_dimension_numbers<[1], [0], [0], [1], [0, 0, 1, 1], [], []>} : vector<32x4xf32>, vector<4x128xf32>, vector<32x128xf32> -> vector<32x128xf32>
    %15 = arith.addf %12, %14 : vector<32x128xf32>
    %c0_18 = arith.constant 0 : index
    %c0_19 = arith.constant 0 : index
    %c0_20 = arith.constant 0 : index
    %16 = vector.load %arg9[%c0_18, %c0_19, %c0_20] : memref<1x32x1xf32, #tpu.memory_space<vmem>>, vector<1x32x1xf32>
    %17 = vector.shape_cast %16 : vector<1x32x1xf32> to vector<32x1xf32>
    %18 = vector.broadcast %17 : vector<32x1xf32> to vector<32x128xf32>
    %19 = arith.addf %15, %18 : vector<32x128xf32>
    %20 = arith.negf %19 : vector<32x128xf32>
    %21 = math.exp %20 : vector<32x128xf32>
    %cst_21 = arith.constant 1.000000e+00 : f32
    %22 = vector.broadcast %cst_21 : f32 to vector<32x128xf32>
    %23 = arith.addf %22, %21 : vector<32x128xf32>
    %24 = arith.divf %22, %23 : vector<32x128xf32>
    %25 = arith.mulf %19, %24 : vector<32x128xf32>
    %c0_22 = arith.constant 0 : index
    %c0_23 = arith.constant 0 : index
    %26 = vector.load %arg10[%c0_22, %c0_23] : memref<4x32xf32, #tpu.memory_space<vmem>>, vector<4x32xf32>
    %cst_24 = arith.constant dense<0.000000e+00> : vector<4x128xf32>
    %27 = tpu.matmul %26, %25, %cst_24 {dimension_numbers = #tpu.dot_dimension_numbers<[1], [0], [0], [1], [0, 0, 1, 1], [], []>} : vector<4x32xf32>, vector<32x128xf32>, vector<4x128xf32> -> vector<4x128xf32>
    %c0_25 = arith.constant 0 : index
    %c0_26 = arith.constant 0 : index
    %28 = vector.load %arg11[%c0_25, %c0_26] : memref<4x1xf32, #tpu.memory_space<vmem>>, vector<4x1xf32>
    %29 = vector.broadcast %28 : vector<4x1xf32> to vector<4x128xf32>
    %30 = arith.addf %27, %29 : vector<4x128xf32>
    %31 = arith.subf %30, %3 : vector<4x128xf32>
    %32 = arith.mulf %31, %31 : vector<4x128xf32>
    %c0_i32 = arith.constant 0 : i32
    %33 = arith.cmpi slt, %arg1, %c0_i32 : i32
    %34 = arith.extui %33 : i1 to i32
    %c0_i32_27 = arith.constant 0 : i32
    %35 = arith.cmpi ne, %34, %c0_i32_27 : i32
    scf.if %35 {
      %39 = vector.shape_cast %32 : vector<4x128xf32> to vector<1x4x128xf32>
      %cst_30 = arith.constant dense<0.000000e+00> : vector<1xf32>
      %40 = vector.multi_reduction <add>, %39, %cst_30 [1, 2] : vector<1x4x128xf32> to vector<1xf32>
      %41 = vector.shape_cast %40 : vector<1xf32> to vector<1x1x1xf32>
      %42 = vector.extract %41[0, 0, 0] : f32 from vector<1x1x1xf32>
      %43 = vector.broadcast %42 : f32 to vector<1x1xf32>
      %c0_31 = arith.constant 0 : index
      %c0_32 = arith.constant 0 : index
      %c0_33 = arith.constant 0 : index
      %c0_34 = arith.constant 0 : index
      %44 = vector.load %arg12[%c0_31, %c0_32, %c0_33, %c0_34] : memref<1x1x1x1xf32, #tpu.memory_space<vmem>>, vector<1x1x1x1xf32>
      %45 = vector.shape_cast %44 : vector<1x1x1x1xf32> to vector<1x1xf32>
      %46 = vector.shape_cast %43 : vector<1x1xf32> to vector<1x1x1x1xf32>
      tpu.vector_store %arg12[%c0_31, %c0_32, %c0_33, %c0_34], %46 {strides = array<i32>} : memref<1x1x1x1xf32, #tpu.memory_space<vmem>>, vector<1x1x1x1xf32>,
    } else {
    }
    %c0_i32_28 = arith.constant 0 : i32
    %36 = arith.cmpi eq, %arg1, %c0_i32_28 : i32
    %37 = arith.extui %36 : i1 to i32
    %c0_i32_29 = arith.constant 0 : i32
    %38 = arith.cmpi ne, %37, %c0_i32_29 : i32
    scf.if %38 {
      %39 = tpu.iota {dimensions = array<i32: 1>} : vector<4x128xi32>
      %c128_i32 = arith.constant 128 : i32
      %40 = arith.muli %arg1, %c128_i32 : i32
      %41 = vector.broadcast %40 : i32 to vector<4x128xi32>
      %42 = arith.addi %39, %41 : vector<4x128xi32>
      %43 = arith.index_cast %arg0 : i32 to index
      %c1 = arith.constant 1 : index
      %44 = memref.load %arg2[%43, %c1] : memref<2x2xi32, #tpu.memory_space<smem>>
      %45 = vector.broadcast %44 : i32 to vector<4x128xi32>
      %46 = arith.cmpi slt, %42, %45 : vector<4x128xi32>
      %cst_30 = arith.constant 0.000000e+00 : f32
      %47 = vector.broadcast %cst_30 : f32 to vector<4x128xf32>
      %48 = arith.select %46, %32, %47 : vector<4x128xi1>, vector<4x128xf32>
      %49 = vector.shape_cast %48 : vector<4x128xf32> to vector<1x4x128xf32>
      %cst_31 = arith.constant dense<0.000000e+00> : vector<1xf32>
      %50 = vector.multi_reduction <add>, %49, %cst_31 [1, 2] : vector<1x4x128xf32> to vector<1xf32>
      %51 = vector.shape_cast %50 : vector<1xf32> to vector<1x1x1xf32>
      %52 = vector.extract %51[0, 0, 0] : f32 from vector<1x1x1xf32>
      %53 = vector.broadcast %52 : f32 to vector<1x1xf32>
      %c0_32 = arith.constant 0 : index
      %c0_33 = arith.constant 0 : index
      %c0_34 = arith.constant 0 : index
      %c0_35 = arith.constant 0 : index
      %54 = vector.load %arg12[%c0_32, %c0_33, %c0_34, %c0_35] : memref<1x1x1x1xf32, #tpu.memory_space<vmem>>, vector<1x1x1x1xf32>
      %55 = vector.shape_cast %54 : vector<1x1x1x1xf32> to vector<1x1xf32>
      %56 = vector.shape_cast %53 : vector<1x1xf32> to vector<1x1x1x1xf32>
      tpu.vector_store %arg12[%c0_32, %c0_33, %c0_34, %c0_35], %56 {strides = array<i32>} : memref<1x1x1x1xf32, #tpu.memory_space<vmem>>, vector<1x1x1x1xf32>,
    } else {
    }
    return
  }
  func.func @transform_0(%arg0: i32, %arg1: i32, %arg2: memref<2x2xi32, #tpu.memory_space<smem>>) -> (i32, i32, i32) {
    %c0_i32 = arith.constant 0 : i32
    %c0_i32_0 = arith.constant 0 : i32
    return %arg0, %c0_i32, %arg1 : i32, i32, i32
  }
  func.func @transform_1(%arg0: i32, %arg1: i32, %arg2: memref<2x2xi32, #tpu.memory_space<smem>>) -> (i32, i32, i32) {
    %c0_i32 = arith.constant 0 : i32
    %c0_i32_0 = arith.constant 0 : i32
    return %arg0, %c0_i32, %arg1 : i32, i32, i32
  }
  func.func @transform_2(%arg0: i32, %arg1: i32, %arg2: memref<2x2xi32, #tpu.memory_space<smem>>) -> (i32, i32, i32) {
    %c0_i32 = arith.constant 0 : i32
    %c0_i32_0 = arith.constant 0 : i32
    return %arg0, %c0_i32, %arg1 : i32, i32, i32
  }
  func.func @transform_3(%arg0: i32, %arg1: i32, %arg2: memref<2x2xi32, #tpu.memory_space<smem>>) -> (i32, i32, i32) {
    %c0_i32 = arith.constant 0 : i32
    %c0_i32_0 = arith.constant 0 : i32
    %c0_i32_1 = arith.constant 0 : i32
    return %arg0, %c0_i32, %c0_i32_0 : i32, i32, i32
  }
  func.func @transform_4(%arg0: i32, %arg1: i32, %arg2: memref<2x2xi32, #tpu.memory_space<smem>>) -> (i32, i32, i32) {
    %c0_i32 = arith.constant 0 : i32
    %c0_i32_0 = arith.constant 0 : i32
    %c0_i32_1 = arith.constant 0 : i32
    return %arg0, %c0_i32, %c0_i32_0 : i32, i32, i32
  }
  func.func @transform_5(%arg0: i32, %arg1: i32, %arg2: memref<2x2xi32, #tpu.memory_space<smem>>) -> (i32, i32) {
    %c0_i32 = arith.constant 0 : i32
    %c0_i32_0 = arith.constant 0 : i32
    %c0_i32_1 = arith.constant 0 : i32
    return %c0_i32, %c0_i32_0 : i32, i32
  }
  func.func @transform_6(%arg0: i32, %arg1: i32, %arg2: memref<2x2xi32, #tpu.memory_space<smem>>) -> (i32, i32, i32) {
    %c0_i32 = arith.constant 0 : i32
    %c0_i32_0 = arith.constant 0 : i32
    %c0_i32_1 = arith.constant 0 : i32
    return %arg0, %c0_i32, %c0_i32_0 : i32, i32, i32
  }
  func.func @transform_7(%arg0: i32, %arg1: i32, %arg2: memref<2x2xi32, #tpu.memory_space<smem>>) -> (i32, i32) {
    %c0_i32 = arith.constant 0 : i32
    %c0_i32_0 = arith.constant 0 : i32
    %c0_i32_1 = arith.constant 0 : i32
    return %c0_i32, %c0_i32_0 : i32, i32
  }
  func.func @transform_8(%arg0: i32, %arg1: i32, %arg2: memref<2x2xi32, #tpu.memory_space<smem>>) -> (i32, i32) {
    %c0_i32 = arith.constant 0 : i32
    %c0_i32_0 = arith.constant 0 : i32
    %c0_i32_1 = arith.constant 0 : i32
    return %c0_i32, %c0_i32_0 : i32, i32
  }
  func.func @transform_9(%arg0: i32, %arg1: i32, %arg2: memref<2x2xi32, #tpu.memory_space<smem>>) -> (i32, i32, i32, i32) {
    %c0_i32 = arith.constant 0 : i32
    %c0_i32_0 = arith.constant 0 : i32
    %c0_i32_1 = arith.constant 0 : i32
    return %arg0, %arg1, %c0_i32, %c0_i32_0 : i32, i32, i32, i32
  }
}

</mosaic_0001>

<bundles_post_ra>
// kernel: tpu_custom_call.1
= control target key start
LH: loop header
LB: loop body
LE: loop exit
PB: predicated region body
PF: predicated region fallthrough
CT: control target
= control target key end

     0   :  { %s1478_s0 = inlined_call_operand.vmem [shape: s32[2,2], index: 0, kind: input, shape index: {}]   ;;  %s1479_s1 = inlined_call_operand.vmem [shape: f32[2,4,128], index: 1, kind: input, shape index: {}]   ;;  %s1480_s2 = inlined_call_operand.vmem [shape: f32[2,4,128], index: 2, kind: input, shape index: {}]   ;;  %s1481_s3 = inlined_call_operand.vmem [shape: f32[2,4,128], index: 3, kind: input, shape index: {}]   ;;  %s1482_s4 = inlined_call_operand.vmem [shape: f32[2,32,4], index: 4, kind: input, shape index: {}]   ;;  %s1483_s5 = inlined_call_operand.vmem [shape: f32[2,32,4], index: 5, kind: input, shape index: {}]   ;;  %s1484_s6 = inlined_call_operand.vmem [shape: f32[32,4], index: 6, kind: input, shape index: {}]   ;;  %s1485_s7 = inlined_call_operand.vmem [shape: f32[2,32,1], index: 7, kind: input, shape index: {}]   ;;  %s1486_s8 = inlined_call_operand.vmem [shape: f32[4,32], index: 8, kind: input, shape index: {}]   ;;  %s1487_s9 = inlined_call_operand.vmem [shape: f32[4,1], index: 9, kind: input, shape index: {}]   ;;  %s1488_s10 = inlined_call_operand.vmem [shape: f32[2,1,1,1], index: 10, kind: output, shape index: {}]  }
   0x1   :  { %s15_s15 = sshll.u32 %s1478_s0, 4  ;;  %s16_s15 = int_to_ptr.vmem [resolvable:$true] %s15_s15 }
   0x2   :  { %s1277_s16 = scalar_lea.vmem %s16_s15, 32  ;;  %p1282_p1 = scmp.lt.s32.totalorder %s16_s15, %s16_s15 }
   0x3   :  { %p1278_p0 = scmp.ne.s32.totalorder %s16_s15, %s1277_s16  ;;  %p1283_p2 = scmp.lt.s32.totalorder %s1277_s16, %s1277_s16 }
   0x5   :  { %p1284_p3 = por %p1283_p2, %p1282_p1 }
   0x7   :  { %p1285_p4 = pnand %p1284_p3, %p1278_p0 }
   0x9   :  { %1288 = shalt.err (!%p1285_p4)  }
   0xa   :  { %s1315_s17 = smov [#allocation3]  }
   0xb   :  { %18 = dma.vmem_to_smem %s16_s15, 32, %s1315_s17, [#allocation2] }
   0xc   :  { %1301 = dma.done.wait [#allocation2], 32 }
   0xd   :  { %1302 = vsyncadd [#allocation2], 4294967264 }
   0xe   :  { %20 = sfence }
   0xf   :  { %s1378_s18 = smov 0   ;;  %s1380_s19 = smov 0  }
  0x10   :  { %s1382_s20 = smov 0  }
  0x11 LB: > { %s38_s0 = sadd.s32 1, %s1309_s19  ;;  %p1123_p5 = scmp.ge.s32.totalorder %s1313_s20, 1  ;;  %s1313_s20 = sphi %s1382_s20, %s26_s20   ;;  %s1309_s19 = sphi %s1380_s19, %s1490_s19   ;;  %s1305_s18 = sphi %s1378_s18, %s1489_s18  }
  0x12   : > { %p40_p6 = scmp.ge.s32.totalorder %s38_s0, 2  ;;  %p370_p7 = scmp.lt.s32.totalorder %s1313_s20, 3 }
  0x14   : > { %s1492_s0 = smov (%p40_p6, %s38_s0), 0  ;;  %p371_p8 = pnand %p1123_p5, %p370_p7 }
  0x15   : > { %p438_p9 = scmp.lt.s32.totalorder (!%p371_p8), %s1305_s18, 1  ;;  %v1316_v0 = vmov (!%p371_p8), 0   ;;  %vm504_vm0 = vcmask (!%p371_p8), 1043456   ;;  %vm491_vm1 = vcmask (!%p371_p8), 31744   ;;  %v693_v11 = vld [vmem:[%s1484_s6] sm:$0xff] (!%p371_p8)  ;;  %v694_v15 = vld [vmem:[%s1484_s6 + $0x8] sm:$0xff] (!%p371_p8) }
  0x16   : > { %374 = sbr.rel (%p371_p8) target bundleno = 724 (0x2d4), region = 56  ;;  %1259 = vset.pattern.permute.xlu0 (!%p371_p8), %v1316_v0  ;;  %1260 = vset.pattern.permute.xlu1 (!%p371_p8), %v1316_v0  ;;  %v695_v17 = vld [vmem:[%s1484_s6 + $0x10] sm:$0xff] (!%p371_p8)  ;;  %v858_v19 = vld [vmem:[%s1487_s9] sm:$0xf] (!%p371_p8)  ;;  %v696_v20 = vld [vmem:[%s1484_s6 + $0x18] sm:$0xff] (!%p371_p8)  ;;  %v1317_v21 = vmov (!%p371_p8), 0.0|0.0  }
  0x17   : > { %vm1318_vm2 = vmmov (!%p371_p8), 0   ;;  %v1319_v22 = vmov (!%p371_p8), 0.0   ;;  %vm864_vm3 = vcmask (!%p371_p8), 261120   ;;  %vm983_vm5 = vcmask (!%p371_p8), 0  }
  0x1d   : > { %s1400_s21 = scalar_select %p438_p9, %s1305_s18, 1 }
  0x1f   : > { %s1124_s22 = sshll.u32 %s1400_s21, 2  ;;  %s1156_s23 = sshll.u32 %s1400_s21, 5 }
  0x20   : > { %s444_s26 = scalar_lea.vmem %s1479_s1, %s1124_s22  ;;  %s463_s29 = scalar_lea.vmem %s1482_s4, %s1156_s23 }
  0x21   : > { %v480_v1 = vld [vmem:[%s444_s26] sm:$0xf]  ;;  %v484_v3 = vld [vmem:[%s463_s29 + $0x8] sm:$0xff]  ;;  %s451_s12 = scalar_lea.vmem %s1480_s2, %s1124_s22  ;;  %s458_s15 = scalar_lea.vmem %s1481_s3, %s1124_s22  ;;  %v485_v5 = vld [vmem:[%s463_s29 + $0x10] sm:$0xff] }
  0x22   : > { %v483_v2 = vld [vmem:[%s463_s29] sm:$0xff]  ;;  %1187 = vmatprep.subr.msk.mxu0 %vm504_vm0, %v480_v1  ;;  %s468_s24 = scalar_lea.vmem %s1483_s5, %s1156_s23  ;;  %s473_s27 = scalar_lea.vmem %s1485_s7, %s1156_s23  ;;  %v486_v9 = vld [vmem:[%s463_s29 + $0x18] sm:$0xff] }
  0x23   : > { %1189 = vmatprep.mubr.msk.f32.mxu0 %vm491_vm1, %v483_v2  ;;  %v482_v4 = vld [vmem:[%s451_s12] sm:$0xf]  ;;  %1188 = vmatpush3.msk.msra.mxu0 %vm504_vm0, %v480_v1  ;;  %v488_v10 = vld [vmem:[%s468_s24 + $0x8] sm:$0xff]  ;;  %v489_v12 = vld [vmem:[%s468_s24 + $0x10] sm:$0xff]  ;;  %v961_v2 = vlaneseq  ;;  %s479_s22 = scalar_lea.vmem %s1488_s10, %s1400_s21 }
  0x24   : > { %v1425_v6 = vld [vmem:[%s458_s15] sm:$0xf]  ;;  %1190 = vmatmul.mubr.msk.f32.vlgmr.msra.gmra.mrb[0].mxu0 %vm491_vm1, %v484_v3  ;;  %1195 = vmatprep.subr.msk.mxu0 %vm504_vm0, %v482_v4  ;;  %v803_v13 = vld [vmem:[%s473_s27 + $0x10] sm:$0xff]  ;;  %v802_v14 = vld [vmem:[%s473_s27 + $0x8] sm:$0xff] }
  0x25   : > { %v487_v7 = vld [vmem:[%s468_s24] sm:$0xff]  ;;  %1196 = vmatpush3.msk.msra.mxu0 %vm504_vm0, %v482_v4  ;;  %1192 = vmatprep.mubr.msk.f32.mxu0 %vm491_vm1, %v485_v5  ;;  %v490_v16 = vld [vmem:[%s468_s24 + $0x18] sm:$0xff]  ;;  %s1153_s24 = sshll.u32 %s1305_s18, 7  ;;  %v962_v5 = vand.u32 127, %v961_v2 }
  0x26   : > { %v801_v8 = vld [vmem:[%s473_s27] sm:$0xff]  ;;  %1179 = vmatprep.subr.msk.mxu1 %vm504_vm0, %v1425_v6  ;;  %1181 = vmatprep.mubr.msk.f32.mxu1 %vm491_vm1, %v487_v7  ;;  %v804_v18 = vld [vmem:[%s473_s27 + $0x18] sm:$0xff]  ;;  %s967_s25 = sadd.s32 1, %s1153_s24 }
  0x27   : > { %1180 = vmatpush3.msk.msra.mxu1 %vm504_vm0, %v1425_v6  ;;  %807 = vperm.xlu0 %1259, %v801_v8   ;;  %v857_v1 = vld [vmem:[%s1486_s8] sm:$0xf]  ;;  %s968_s26 = sld [smem:[#allocation3 + %s967_s25]] }
  0x28   : > { %1193 = vmatmul.mubr.msk.f32.gmra.mrb[2].mxu0 %vm491_vm1, %v486_v9  ;;  %1182 = vmatmul.mubr.msk.f32.vlgmr.msra.gmra.mrb[0].mxu1 %vm491_vm1, %v488_v10 }
  0x29   : > { %1197 = vmatprep.mubr.msk.f32.mxu0 %vm491_vm1, %v693_v11  ;;  %1184 = vmatprep.mubr.msk.f32.mxu1 %vm491_vm1, %v489_v12 }
  0x2a   : > { %817 = vperm.xlu1 %1260, %v803_v13   ;;  %1214 = vmatprep.subr.bf16.mxu1 %v1317_v21 }
  0x2b   : > { %812 = vperm.xlu0 %1259, %v802_v14  }
  0x2c   : > { %1198 = vmatmul.mubr.msk.f32.vlgmr.msra.gmra.mrb[0].mxu0 %vm491_vm1, %v694_v15  ;;  %1185 = vmatmul.mubr.msk.f32.gmra.mrb[2].mxu1 %vm491_vm1, %v490_v16 }
  0x2d   : > { %1200 = vmatprep.mubr.msk.f32.mxu0 %vm491_vm1, %v695_v17  ;;  %1211 = vmatprep.mubr.msk.f32.mxu1 %vm1318_vm2, %v1319_v22  ;;  %v969_v9 = vstv %s968_s26 }
  0x2e   : > { %822 = vperm.xlu1 %1260, %v804_v18   ;;  %vm970_vm4 = vcmp.lt.s32.totalorder %v962_v5, %v969_v9 }
  0x2f   : > { %861 = vperm.xlu0 %1259, %v858_v19  }
  0x30   : > { %1201 = vmatmul.mubr.msk.f32.gmra.mrb[2].mxu0 %vm491_vm1, %v696_v20 }
  0xa6   : > { %v808_v23 = vpop.permute.xlu0 %807 }
  0xa9   : > { %v818_v26 = vpop.permute.xlu1 %817 }
  0xaa   : > { %v813_v32 = vpop.permute.xlu0 %812 }
  0xad   : > { %v823_v41 = vpop.permute.xlu1 %822 }
  0xae   : > { %v862_v3 = vpop.permute.xlu0 %861 }
  0xfb   : > { %v1183_v24 = vpop.f32.mrb[0].mxu1 }
  0xfc   : > { %v574_v25 = vpop.f32.mrb[1].mxu1 }
  0xff   : > { %v1199_v27 = vpop.f32.mrb[0].mxu0  ;;  %v1186_v28 = vpop.f32.mrb[2].mxu1 }
 0x100   : > { %v1220_v29 = vadd.f32 %v1199_v27, %v1183_v24  ;;  %v778_v30 = vpop.f32.mrb[1].mxu0  ;;  %v584_v31 = vpop.f32.mrb[3].mxu1 }
 0x101   : > { %v1221_v33 = vadd.f32 %v778_v30, %v574_v25 }
 0x102   : > { %v826_v34 = vadd.f32 %v1220_v29, %v813_v32 }
 0x103   : > { %v825_v35 = vadd.f32 %v1221_v33, %v808_v23  ;;  %v1202_v36 = vpop.f32.mrb[2].mxu0 }
 0x104   : > { %v1149_v37 = vmul.f32 -1.442695, %v826_v34  ;;  %v1222_v38 = vadd.f32 %v1202_v36, %v1186_v28  ;;  %v788_v39 = vpop.f32.mrb[3].mxu0 }
 0x105   : > { %v1148_v40 = vmul.f32 -1.442695, %v825_v35  ;;  %v1223_v42 = vadd.f32 %v788_v39, %v584_v31 }
 0x106   : > { %1261 = vpow2.f32 %v1149_v37  ;;  %v828_v43 = vadd.f32 %v1222_v38, %v823_v41 }
 0x107   : > { %1263 = vpow2.f32 %v1148_v40  ;;  %v827_v44 = vadd.f32 %v1223_v42, %v818_v26 }
 0x108   : > { %v1151_v45 = vmul.f32 -1.442695, %v828_v43 }
 0x109   : > { %v1150_v46 = vmul.f32 -1.442695, %v827_v44 }
 0x10a   : > { %1265 = vpow2.f32 %v1151_v45 }
 0x10b   : > { %1267 = vpow2.f32 %v1150_v46 }
 0x110   : > { %v1262_v47 = vpop.eup %1261 }
 0x111   : > { %v1264_v48 = vpop.eup %1263  ;;  %v842_v49 = vadd.f32 1.0, %v1262_v47 }
 0x112   : > { %v841_v50 = vadd.f32 1.0, %v1264_v48 }
 0x113   : > { %1269 = vrcp.f32 %v842_v49 }
 0x114   : > { %v1266_v51 = vpop.eup %1265  ;;  %1271 = vrcp.f32 %v841_v50 }
 0x115   : > { %v1268_v52 = vpop.eup %1267  ;;  %v844_v53 = vadd.f32 1.0, %v1266_v51 }
 0x116   : > { %v843_v54 = vadd.f32 1.0, %v1268_v52 }
 0x117   : > { %1273 = vrcp.f32 %v844_v53 }
 0x118   : > { %1275 = vrcp.f32 %v843_v54 }
 0x11d   : > { %v1270_v55 = vpop.eup %1269 }
 0x11e   : > { %v1272_v56 = vpop.eup %1271  ;;  %v854_v57 = vmul.f32 %v1270_v55, %v826_v34 }
 0x11f   : > { %v853_v58 = vmul.f32 %v1272_v56, %v825_v35 }
 0x121   : > { %v1274_v59 = vpop.eup %1273  ;;  %v1215_v60 = vpack.c.bf16 %v854_v57, %v853_v58 }
 0x122   : > { %v1276_v61 = vpop.eup %1275  ;;  %v856_v62 = vmul.f32 %v1274_v59, %v828_v43 }
 0x123   : > { %v855_v63 = vmul.f32 %v1276_v61, %v827_v44  ;;  %1216 = vmatpush3.bf16.msra.mxu1 %v1215_v60 }
 0x124   : > { %1217 = vmatprep.subr.bf16.mxu1 %v1317_v21 }
 0x125   : > { %v1218_v0 = vpack.c.bf16 %v856_v62, %v855_v63 }
 0x127   : > { %1219 = vmatpush3.bf16.msra.mxu1 %v1218_v0 }
 0x12a   : > { %1212 = vmatmul.mubr.msk.f32.vlgmr.msra.gmra.mrb[4].mxu1 %vm864_vm3, %v857_v1 }
 0x1fd   : > { %v934_v4 = vpop.f32.mrb[4].mxu1 }
 0x1fe   : > { %v935_v7 = vadd.f32 %v934_v4, %v862_v3  ;;  %v1213_v8 = vpop.f32.mrb[5].mxu1 }
 0x200   : > { %v938_v10 = vsub.f32 %v935_v7, %v1425_v6 }
 0x202   : > { %v939_v11 = vmul.f32 %v938_v10, %v938_v10 }
 0x204   : > { %v971_v12 = vsel %vm970_vm4, %v939_v11, 0.0 }
 0x205   : > { %v972_v13 = vsel %vm504_vm0, %v971_v12, 0.0 }
 0x206   : > { %973 = vadd.xlane.f32.xlu1 %v972_v13 }
 0x293   : > { %v974_v14 = vpop.xlane.xlu1 %973 }
 0x294   : > { %v975_v15 = vrot.slane %v974_v14, 4 }
 0x296   : > { %v976_v16 = vadd.f32 %v975_v15, %v974_v14 }
 0x298   : > { %v977_v17 = vrot.slane %v976_v16, 2 }
 0x29a   : > { %v978_v18 = vadd.f32 %v977_v17, %v976_v16 }
 0x29c   : > { %v979_v19 = vrot.slane %v978_v18, 1 }
 0x29e   : > { %v980_v20 = vadd.f32 %v979_v19, %v978_v18 }
 0x2a0   : > { %1228 = vpush %v980_v20 }
 0x2d1   : > { %s1229_s23 = spop %1228 }
 0x2d2   : > { %v982_v6 = vstv %s1229_s23 }
 0x2d3   : > { %984 = vst.msk [vmem:[%s479_s22] sm:$0x1] %vm983_vm5, %v982_v6 }
 0x2d4 PF: > { %s26_s20 = sadd.s32 1, %s1313_s20   ;;  %s1489_s18 = smov %s1309_s19 }
 0x2d5   : > { %p23_p10 = scmp.ge.s32.totalorder %s26_s20, 4   ;;  %s1490_s19 = smov %s1492_s0 }
 0x2d7   :  { %25 = sbr.rel (!%p23_p10) target bundleno = 17 (0x11), region = 109 }

</bundles_post_ra>
